<compile_context>
chip_gen: v6e
topology: v6e:2x2x1
jax: 0.10.0
libtpu: 0.0.40
codegen_flags: <defaults>
</compile_context>

<pallas_src>
import functools

import jax
import jax.numpy as jnp
from jax.experimental import pallas as pl
from jax.experimental.pallas import tpu as pltpu

_LANE = 128
_MIN_GRID_STEPS = 4          # keep v7x megacore + double-buffering busy


def _cdiv(a, b):
    return -(-a // b)


def _round_up(v, m):
    return (v + m - 1) // m * m


def _sublane(dtype):
    # native sublane tile: 8 for 4-byte, 16 for 2-byte, 32 for 1-byte dtypes
    return max(8, 32 // jnp.dtype(dtype).itemsize)


@functools.lru_cache(maxsize=None)
def _tile_bytes():
    """Per-generation elementwise input-tile budget (bytes)."""
    kind = ""
    try:
        kind = jax.devices()[0].device_kind.lower()
    except Exception:
        pass
    if any(tag in kind for tag in ("v7", "7x", "v6", "6e")):
        # 4 double-buffered (in+out) 4 MiB tiles = 16 MiB << 32 MiB scoped VMEM,
        # and >= ~2.5 us of HBM traffic per step on v7x to hide the ~0.35 us
        # fixed per-step pipeline overhead.
        return 4 << 20
    # v5e (16 MiB default scoped VMEM) and unknown chips: stay at 2 MiB tiles.
    return 2 << 20


def _pick_rows_tile(rows, cols, itemsize, sub):
    """Row-tile height: ~_tile_bytes() per tile, aim for >= _MIN_GRID_STEPS."""
    if rows <= sub:
        return rows                                   # full-dim block (allowed)
    tr_cap = max(sub, (_tile_bytes() // (cols * itemsize)) // sub * sub)
    tr = min(tr_cap, max(sub, _round_up(_cdiv(rows, _MIN_GRID_STEPS), sub)))
    tr = max(sub, min(tr, rows // sub * sub))
    return tr


# ---------------------------------------------------------------- kernels ---

def _const_slope_kernel(x_ref, o_ref, *, slope):
    x = x_ref[...]
    if slope == 0.0:                           # relu
        o_ref[...] = jnp.maximum(x, jnp.zeros((), x.dtype))
    else:                                      # leakyrelu (static slope)
        o_ref[...] = jnp.where(x >= 0, x, jnp.asarray(slope, x.dtype) * x)


def _prelu_kernel(x_ref, slope_ref, o_ref):
    x = x_ref[...]                              # (TR, TC)
    a = slope_ref[...]                          # (TR, 1) per-row (= per-channel)
    o_ref[...] = jnp.where(x >= 0, x, a * x)


# --------------------------------------------------------------- wrappers ---

def _const_slope_relu(x, slope):
    """relu / leakyrelu over a lane-dense (rows, cols) view -- zero copies."""
    shape, dt = x.shape, x.dtype
    itemsize = jnp.dtype(dt).itemsize
    sub = _sublane(dt)
    total = x.size

    # Slab width chosen from the tensor's own divisors so the reshape is free
    # and no pad / slice HBM round trip is ever needed.
    cols = None
    if total % _LANE == 0:
        for cand in (4096, 2048, 1024, 512, 256, 128):
            if total % cand == 0:
                cols = cand
                break
    if cols is None:
        # Element count not a multiple of 128: use the natural last-dim view
        # (block last dim == full array dim, rule-compliant).  Not lane-dense,
        # but still exactly one read + one write with no extra copies.
        cols = shape[-1] if len(shape) > 1 else total
    rows = total // cols

    tr = _pick_rows_tile(rows, cols, itemsize, sub)
    grid = (_cdiv(rows, tr),)                   # ragged last block is masked

    out = pl.pallas_call(
        functools.partial(_const_slope_kernel, slope=slope),
        out_shape=jax.ShapeDtypeStruct((rows, cols), dt),
        grid_spec=pltpu.PrefetchScalarGridSpec(
            num_scalar_prefetch=0,
            grid=grid,
            in_specs=[pl.BlockSpec((tr, cols), lambda i: (i, 0))],
            out_specs=pl.BlockSpec((tr, cols), lambda i: (i, 0)),
        ),
        compiler_params=pltpu.CompilerParams(
            dimension_semantics=("parallel",)),
    )(x.reshape(rows, cols))

    return out.reshape(shape)


def _pick_col_tile(cols):
    """Multiple-of-128 column tile; prefer exact divisors of cols (no pad)."""
    if cols % _LANE != 0:
        return cols                             # full-dim block (rule-compliant)
    cap = 4096
    if cols <= cap:
        return cols
    best = _LANE
    for cand in range(cap, _LANE - 1, -_LANE):
        if cols % cand == 0:
            best = cand
            break
    # If the only divisor is tiny, prefer wide tiles + one clipped last block
    # (cdiv grid) over many narrow tiles -- still no padding.
    return best if best >= 1024 else cap


def _prelu(x, weight):
    """PReLU: per-channel (or shared) slope, (N*C, spatial) layout, no pads."""
    shape, dt = x.shape, x.dtype
    itemsize = jnp.dtype(dt).itemsize
    sub = _sublane(dt)
    N, C = shape[0], shape[1]
    rows = N * C
    cols = x.size // rows

    w = jnp.asarray(weight, dtype=dt).reshape(-1)
    if w.shape[0] == 1 and C > 1:               # PyTorch num_parameters=1 case
        w = jnp.broadcast_to(w, (C,))
    slope = jnp.tile(w, (N,)).reshape(rows, 1)  # tiny (N*C,1) -- negligible

    tc = _pick_col_tile(cols)
    tr = _pick_rows_tile(rows, tc, itemsize, sub)
    grid = (_cdiv(rows, tr), _cdiv(cols, tc))   # ragged edges are masked

    out = pl.pallas_call(
        _prelu_kernel,
        out_shape=jax.ShapeDtypeStruct((rows, cols), dt),
        grid_spec=pltpu.PrefetchScalarGridSpec(
            num_scalar_prefetch=0,
            grid=grid,
            in_specs=[
                pl.BlockSpec((tr, tc), lambda i, j: (i, j)),
                # Column axis innermost + block index (i, 0): the (tr, 1) slope
                # tile is DMA'd once per row-tile (Pallas skips repeat DMAs of
                # an unchanged block index).
                pl.BlockSpec((tr, 1), lambda i, j: (i, 0)),
            ],
            out_specs=pl.BlockSpec((tr, tc), lambda i, j: (i, j)),
        ),
        compiler_params=pltpu.CompilerParams(
            dimension_semantics=("parallel", "parallel")),
    )(x.reshape(rows, cols), slope)

    return out.reshape(shape)


@functools.partial(jax.jit, static_argnames=("relu_type",))
def relu_layer(x, prelu_weight=None, relu_type="relu"):
    """x: (N, C, H, W). prelu_weight: (C,) or (1,), used only for 'prelu'."""
    relu_type = relu_type.lower()
    if relu_type == "none":
        return x                                  # identity, no kernel launch
    if relu_type == "relu":
        return _const_slope_relu(x, 0.0)
    if relu_type == "leakyrelu":
        return _const_slope_relu(x, 0.2)          # matches nn.LeakyReLU(0.2)
    if relu_type == "prelu":
        return _prelu(x, prelu_weight)
    raise ValueError(f"Relu type {relu_type} not support.")


# ------------------------------------------------------------------- test ---

if __name__ == "__main__":
    key = jax.random.PRNGKey(0)
    k_x, k_w = jax.random.split(key)
    N, C, H, W = 2, 4, 16, 16
    x = jax.random.normal(k_x, (N, C, H, W), dtype=jnp.float32)

    # deterministic per-channel PReLU slopes (PyTorch init would be 0.25)
    prelu_w = jax.random.uniform(k_w, (C,), minval=0.05, maxval=0.5,
                                 dtype=jnp.float32)

    ok = True
    for rt in ("relu", "leakyrelu", "prelu", "none"):
        y = jax.block_until_ready(relu_layer(x, prelu_w, relu_type=rt))
        if rt == "relu":
            ref = jnp.maximum(x, 0.0)
        elif rt == "leakyrelu":
            ref = jnp.where(x >= 0, x, 0.2 * x)
        elif rt == "prelu":
            ref = jnp.where(x >= 0, x, prelu_w[None, :, None, None] * x)
        else:
            ref = x
        good = bool(jnp.allclose(y, ref, atol=1e-6, rtol=1e-6))
        if not good:
            print(f"MISMATCH for relu_type={rt}")
        ok &= good

    # PyTorch nn.PReLU default (num_parameters=1): single shared slope.
    shared_w = jnp.asarray([0.25], dtype=jnp.float32)
    y = jax.block_until_ready(relu_layer(x, shared_w, relu_type="prelu"))
    ref = jnp.where(x >= 0, x, 0.25 * x)
    good = bool(jnp.allclose(y, ref, atol=1e-6, rtol=1e-6))
    if not good:
        print("MISMATCH for relu_type=prelu (shared slope)")
    ok &= good

    if ok:
        print("KERNEL_OK")
</pallas_src>

<mosaic_0001>
module attributes {stable_mosaic.version = 11 : i64} {
  func.func @_const_slope_kernel(%arg0: i32, %arg1: memref<1x2048xf32, #tpu.memory_space<vmem>>, %arg2: memref<1x2048xf32, #tpu.memory_space<vmem>>) attributes {dimension_semantics = [#tpu.dimension_semantics<parallel>], iteration_bounds = array<i64: 1>, scalar_prefetch = 0 : i64, scratch_operands = 0 : i64, tpu.core_type = #tpu.core_type<tc>, window_params = [{transform_indices = @transform_0, window_bounds = array<i64: 1, 2048>}, {transform_indices = @transform_1, window_bounds = array<i64: 1, 2048>}]} {
    %c0 = arith.constant 0 : index
    %c0_0 = arith.constant 0 : index
    %0 = vector.load %arg1[%c0, %c0_0] : memref<1x2048xf32, #tpu.memory_space<vmem>>, vector<1x2048xf32>
    %cst = arith.constant 0.000000e+00 : f32
    %1 = vector.broadcast %cst : f32 to vector<1x2048xf32>
    %2 = arith.maximumf %0, %1 : vector<1x2048xf32>
    %c0_1 = arith.constant 0 : index
    %c0_2 = arith.constant 0 : index
    %3 = vector.load %arg2[%c0_1, %c0_2] : memref<1x2048xf32, #tpu.memory_space<vmem>>, vector<1x2048xf32>
    tpu.vector_store %arg2[%c0_1, %c0_2], %2 {strides = array<i32>} : memref<1x2048xf32, #tpu.memory_space<vmem>>, vector<1x2048xf32>,
    return
  }
  func.func @transform_0(%arg0: i32) -> (i32, i32) {
    %c0_i32 = arith.constant 0 : i32
    %c0_i32_0 = arith.constant 0 : i32
    return %arg0, %c0_i32 : i32, i32
  }
  func.func @transform_1(%arg0: i32) -> (i32, i32) {
    %c0_i32 = arith.constant 0 : i32
    %c0_i32_0 = arith.constant 0 : i32
    return %arg0, %c0_i32 : i32, i32
  }
}

</mosaic_0001>

<bundles_post_ra>
// kernel: relu_layer.1
= control target key start
LH: loop header
LB: loop body
LE: loop exit
PB: predicated region body
PF: predicated region fallthrough
CT: control target
= control target key end

     0   :  { %s40_s0 = inlined_call_operand.vmem [shape: f32[1,2048], index: 0, kind: input, shape index: {}]   ;;  %s41_s1 = inlined_call_operand.vmem [shape: f32[1,2048], index: 1, kind: output, shape index: {}]  }
   0x1   :  { %v8_v0 = vld [vmem:[%s40_s0] sm:$0xff]  ;;  %v9_v1 = vld [vmem:[%s40_s0 + $0x8] sm:$0xff] }
   0x2   :  { %v10_v2 = vmax.f32 %v8_v0, 0.0  ;;  %v11_v3 = vmax.f32 %v9_v1, 0.0 }
   0x4   :  { %12 = vst [vmem:[%s41_s1] sm:$0xff] %v10_v2  ;;  %13 = vst [vmem:[%s41_s1 + $0x8] sm:$0xff] %v11_v3 }

</bundles_post_ra>
